<compile_context>
chip_gen: v6e
topology: v6e:2x2x1
jax: 0.10.0
libtpu: 0.0.40
codegen_flags: <defaults>
</compile_context>

<pallas_src>
import jax
import jax.numpy as jnp
from jax.experimental import pallas as pl
from jax.experimental.pallas import tpu as pltpu


_VMEM_BUDGET = 40 << 20      # conservative working-set budget (fits every gen)
_VMEM_LIMIT_CAP = 48 << 20   # scoped VMEM limit cap (v7x physical is 64 MiB/TC)


def _round_up(x, m):
    return ((x + m - 1) // m) * m


def _choose_batch_tile(batch, cap=512):
    """Pick (padded_batch, tm).  tm is a multiple of 8, zero-padding waste is
    bounded to <= 1/8 of the padded rows, and when batch >= 128 we guarantee
    >= 2 batch tiles so the 'parallel' grid axis can be sharded across both
    v7x TensorCores."""
    if batch <= 8:
        return 8, 8
    want_two_tiles = batch >= 128
    start = min(cap, _round_up(batch, 8))
    fallback = None
    for t in range(start, 7, -8):
        b_p = _round_up(batch, t)
        waste_ok = (b_p - batch) * 8 <= b_p
        tiles_ok = (not want_two_tiles) or (b_p // t >= 2)
        if waste_ok and tiles_ok:
            return b_p, t
        if fallback is None or b_p < fallback[0]:
            fallback = (b_p, t)
    return fallback


def _fullk_bytes(tm, k, fc_p):
    """VMEM working set of the full-K (resident W1) kernel, incl. double buffers."""
    return (2 * tm * k * 4          # streamed x tile (double-buffered)
            + 2 * k * fc_p * 4      # resident W1 (pipeline keeps 2 buffers)
            + tm * fc_p * 4         # hidden activation
            + 4 * fc_p * 4          # b1 + w2 rows
            + 4 * tm * 4)           # output tile


def _ktiled_bytes(tm, tk, fc_p):
    """VMEM working set of the K-tiled fallback kernel."""
    return (2 * tm * tk * 4         # x tile
            + 2 * tk * fc_p * 4     # W1 tile
            + tm * fc_p * 4         # f32 accumulator scratch
            + 4 * fc_p * 4
            + 4 * tm * 4)


# ---------------------------------------------------------------------------
# Kernels
# ---------------------------------------------------------------------------

def _bc_fullk_kernel(x_ref, w1_ref, b1_ref, w2_ref, b2_ref, o_ref):
    # x_ref : (TM, K)    f32  batch tile of flattened input (full K)
    # w1_ref: (K, FCp)   f32  resident layer-1 weight (constant block index)
    # b1_ref: (1, FCp)   f32  resident layer-1 bias
    # w2_ref: (1, FCp)   f32  resident layer-2 weight as a row
    # b2_ref: (1, 1)     f32  SMEM scalar
    # o_ref : (TM, 1)    f32  output tile
    h = jnp.dot(x_ref[...], w1_ref[...], preferred_element_type=jnp.float32)
    h = jnp.maximum(h + b1_ref[...], 0.0)                         # bias + ReLU
    # TODO(synk): nn.Dropout is identity at inference; no train-mode RNG mask.
    # Layer 2 (N=1 matmul) as VPU multiply + cross-lane reduction.
    logit = jnp.sum(h * w2_ref[...], axis=-1, keepdims=True) + b2_ref[0, 0]
    o_ref[...] = jax.nn.sigmoid(logit)


def _bc_ktiled_kernel(x_ref, w1_ref, b1_ref, w2_ref, b2_ref, o_ref, acc_ref):
    # Fallback for K too large to keep W1 / a full-K x tile resident.
    k = pl.program_id(1)

    @pl.when(k == 0)
    def _():
        acc_ref[...] = jnp.zeros_like(acc_ref)

    acc_ref[...] += jnp.dot(x_ref[...], w1_ref[...],
                            preferred_element_type=jnp.float32)

    @pl.when(k == pl.num_programs(1) - 1)
    def _():
        h = jnp.maximum(acc_ref[...] + b1_ref[...], 0.0)
        # TODO(synk): nn.Dropout is identity at inference.
        logit = jnp.sum(h * w2_ref[...], axis=-1, keepdims=True) + b2_ref[0, 0]
        o_ref[...] = jax.nn.sigmoid(logit)


# ---------------------------------------------------------------------------
# Wrapper
# ---------------------------------------------------------------------------

def binary_classifier_forward(x, w1, b1, w2, b2):
    """x: (B, ...) f32; w1: (K, fc); b1: (1, fc); w2: (fc, 1); b2: (1, 1).
    Returns (B, 1) f32 == sigmoid(relu(flatten(x) @ w1 + b1) @ w2 + b2)."""
    batch = x.shape[0]
    x_flat = x.reshape(batch, -1)                  # nn.Flatten (row-major view)
    in_features = x_flat.shape[1]
    fc = w1.shape[1]
    assert w1.shape == (in_features, fc)
    assert b1.shape == (1, fc)
    assert w2.shape == (fc, 1)
    assert b2.shape == (1, 1)

    # Lane-dense hidden layer.  (If fc ever exceeds 128 and the kernel becomes
    # compute-bound, pad to 256 on v6e/v7x to fill the 256-wide MXU.)
    fc_p = _round_up(fc, 128)

    # Small layer-1/2 params padded once.  Padded fc lanes have zero weight /
    # bias and zero w2 entry, so they vanish after ReLU and the lane reduction.
    w1_f = w1.astype(jnp.float32)
    if fc_p != fc:
        w1_f = jnp.pad(w1_f, ((0, 0), (0, fc_p - fc)))
    b1_p = jnp.pad(b1.astype(jnp.float32), ((0, 0), (0, fc_p - fc)))
    w2_row = jnp.pad(w2.astype(jnp.float32).T, ((0, 0), (0, fc_p - fc)))
    b2_s = b2.astype(jnp.float32)
    x_f = x_flat.astype(jnp.float32)

    b_p, tm = _choose_batch_tile(batch)

    # Try the full-K / resident-W1 fast path, shrinking the batch tile if that
    # is what it takes to fit VMEM.
    tm_fk, b_p_fk = tm, b_p
    while tm_fk > 8 and _fullk_bytes(tm_fk, in_features, fc_p) > _VMEM_BUDGET:
        tm_fk = max(8, (tm_fk // 2) // 8 * 8)
        b_p_fk = _round_up(batch, tm_fk)
    use_fullk = _fullk_bytes(tm_fk, in_features, fc_p) <= _VMEM_BUDGET

    if use_fullk:
        # ---------------- fast path: grid over batch only ----------------
        tm, b_p = tm_fk, b_p_fk
        n_b = b_p // tm
        x_in = x_f
        if b_p != batch:
            x_in = jnp.pad(x_f, ((0, b_p - batch), (0, 0)))  # batch rows only

        ws = _fullk_bytes(tm, in_features, fc_p)
        vmem_limit = int(min(max(2 * ws, 8 << 20), _VMEM_LIMIT_CAP))
        cost = pl.CostEstimate(
            flops=2 * b_p * in_features * fc_p + 4 * b_p * fc_p,
            transcendentals=b_p,
            bytes_accessed=4 * (b_p * in_features + in_features * fc_p
                                + 2 * fc_p + b_p),
        )

        out = pl.pallas_call(
            _bc_fullk_kernel,
            out_shape=jax.ShapeDtypeStruct((b_p, 1), jnp.float32),
            grid_spec=pltpu.PrefetchScalarGridSpec(
                num_scalar_prefetch=0,
                grid=(n_b,),
                in_specs=[
                    pl.BlockSpec((tm, in_features), lambda i: (i, 0)),    # x tile
                    pl.BlockSpec((in_features, fc_p), lambda i: (0, 0)),  # W1 resident
                    pl.BlockSpec((1, fc_p), lambda i: (0, 0)),            # b1 resident
                    pl.BlockSpec((1, fc_p), lambda i: (0, 0)),            # w2 row
                    pl.BlockSpec(memory_space=pltpu.MemorySpace.SMEM),    # b2 scalar
                ],
                out_specs=pl.BlockSpec((tm, 1), lambda i: (i, 0)),
            ),
            compiler_params=pltpu.CompilerParams(
                dimension_semantics=("parallel",),
                vmem_limit_bytes=vmem_limit,
            ),
            cost_estimate=cost,
        )(x_in, w1_f, b1_p, w2_row, b2_s)
        return out[:batch]

    # ---------------- fallback: stream K tiles with f32 accumulator ----------
    tk = min(2048, _round_up(in_features, 128))
    while tk > 128 and _ktiled_bytes(tm, tk, fc_p) > _VMEM_BUDGET:
        tk = max(128, tk // 2)
    while tm > 8 and _ktiled_bytes(tm, tk, fc_p) > _VMEM_BUDGET:
        tm = max(8, (tm // 2) // 8 * 8)
        b_p = _round_up(batch, tm)
    n_b = b_p // tm
    k_p = _round_up(in_features, tk)
    n_k = k_p // tk

    x_in = x_f
    if (b_p, k_p) != x_f.shape:
        x_in = jnp.pad(x_f, ((0, b_p - batch), (0, k_p - in_features)))
    w1_in = w1_f
    if k_p != in_features:
        w1_in = jnp.pad(w1_f, ((0, k_p - in_features), (0, 0)))

    ws = _ktiled_bytes(tm, tk, fc_p)
    vmem_limit = int(min(max(2 * ws, 8 << 20), _VMEM_LIMIT_CAP))
    cost = pl.CostEstimate(
        flops=2 * b_p * k_p * fc_p + 4 * b_p * fc_p,
        transcendentals=b_p,
        bytes_accessed=4 * (b_p * k_p + n_b * k_p * fc_p + 2 * fc_p + b_p),
    )

    out = pl.pallas_call(
        _bc_ktiled_kernel,
        out_shape=jax.ShapeDtypeStruct((b_p, 1), jnp.float32),
        grid_spec=pltpu.PrefetchScalarGridSpec(
            num_scalar_prefetch=0,
            grid=(n_b, n_k),
            in_specs=[
                pl.BlockSpec((tm, tk), lambda i, k: (i, k)),          # x tile
                pl.BlockSpec((tk, fc_p), lambda i, k: (k, 0)),        # W1 tile
                pl.BlockSpec((1, fc_p), lambda i, k: (0, 0)),         # b1 resident
                pl.BlockSpec((1, fc_p), lambda i, k: (0, 0)),         # w2 row
                pl.BlockSpec(memory_space=pltpu.MemorySpace.SMEM),    # b2 scalar
            ],
            out_specs=pl.BlockSpec((tm, 1), lambda i, k: (i, 0)),
            scratch_shapes=[pltpu.VMEM((tm, fc_p), jnp.float32)],
        ),
        compiler_params=pltpu.CompilerParams(
            dimension_semantics=("parallel", "arbitrary"),
            vmem_limit_bytes=vmem_limit,
        ),
        cost_estimate=cost,
    )(x_in, w1_in, b1_p, w2_row, b2_s)
    return out[:batch]


def init_params(key, in_features, fc_neuron):
    """Deterministic init mimicking nn.Linear's U(-1/sqrt(fan_in), 1/sqrt(fan_in))."""
    k1, k2, k3, k4 = jax.random.split(key, 4)
    bound1 = 1.0 / jnp.sqrt(jnp.float32(in_features))
    bound2 = 1.0 / jnp.sqrt(jnp.float32(fc_neuron))
    w1 = jax.random.uniform(k1, (in_features, fc_neuron), jnp.float32, -bound1, bound1)
    b1 = jax.random.uniform(k2, (1, fc_neuron), jnp.float32, -bound1, bound1)
    w2 = jax.random.uniform(k3, (fc_neuron, 1), jnp.float32, -bound2, bound2)
    b2 = jax.random.uniform(k4, (1, 1), jnp.float32, -bound2, bound2)
    return w1, b1, w2, b2


if __name__ == "__main__":
    key = jax.random.PRNGKey(0)
    kx, kp = jax.random.split(key)

    # Small shapes consistent with the module: NCHW input, fc_neuron hidden units.
    batch, C, H, W = 2, 4, 16, 16
    fc_neuron = 32
    in_features = C * H * W

    x = jax.random.normal(kx, (batch, C, H, W), jnp.float32)
    w1, b1, w2, b2 = init_params(kp, in_features, fc_neuron)

    out = binary_classifier_forward(x, w1, b1, w2, b2)
    out = jax.block_until_ready(out)

    # Pure-JAX f32 reference of the same math.
    xf = x.reshape(batch, -1)
    hidden = jnp.maximum(
        jnp.dot(xf, w1, precision=jax.lax.Precision.HIGHEST) + b1, 0.0)
    ref = jax.nn.sigmoid(
        jnp.dot(hidden, w2, precision=jax.lax.Precision.HIGHEST) + b2)

    assert out.shape == (batch, 1)
    assert jnp.allclose(out, ref, atol=2e-3, rtol=2e-3)

    print("KERNEL_OK")
</pallas_src>

<mosaic_0001>
module attributes {stable_mosaic.version = 11 : i64} {
  func.func @_bc_fullk_kernel(%arg0: i32, %arg1: memref<8x1024xf32, #tpu.memory_space<vmem>>, %arg2: memref<1024x128xf32, #tpu.memory_space<vmem>>, %arg3: memref<1x128xf32, #tpu.memory_space<vmem>>, %arg4: memref<1x128xf32, #tpu.memory_space<vmem>>, %arg5: memref<1x1xf32, #tpu.memory_space<smem>>, %arg6: memref<8x1xf32, #tpu.memory_space<vmem>>) attributes {dimension_semantics = [#tpu.dimension_semantics<parallel>], iteration_bounds = array<i64: 1>, scalar_prefetch = 0 : i64, scratch_operands = 0 : i64, tpu.core_type = #tpu.core_type<tc>, window_params = [{transform_indices = @transform_0, window_bounds = array<i64: 8, 1024>}, {pipeline_mode = #tpu.pipeline_mode<synchronous>, transform_indices = @transform_1, window_bounds = array<i64: 1024, 128>}, {pipeline_mode = #tpu.pipeline_mode<synchronous>, transform_indices = @transform_2, window_bounds = array<i64: 1, 128>}, {pipeline_mode = #tpu.pipeline_mode<synchronous>, transform_indices = @transform_3, window_bounds = array<i64: 1, 128>}, {transform_indices = @transform_4, window_bounds = array<i64: 1, 1>}, {transform_indices = @transform_5, window_bounds = array<i64: 8, 1>}]} {
    %c0 = arith.constant 0 : index
    %c0_0 = arith.constant 0 : index
    %0 = vector.load %arg1[%c0, %c0_0] : memref<8x1024xf32, #tpu.memory_space<vmem>>, vector<8x1024xf32>
    %c0_1 = arith.constant 0 : index
    %c0_2 = arith.constant 0 : index
    %1 = vector.load %arg2[%c0_1, %c0_2] : memref<1024x128xf32, #tpu.memory_space<vmem>>, vector<1024x128xf32>
    %cst = arith.constant dense<0.000000e+00> : vector<8x128xf32>
    %2 = tpu.matmul %0, %1, %cst {dimension_numbers = #tpu.dot_dimension_numbers<[1], [0], [0], [1], [0, 0, 1, 1], [], []>} : vector<8x1024xf32>, vector<1024x128xf32>, vector<8x128xf32> -> vector<8x128xf32>
    %c0_3 = arith.constant 0 : index
    %c0_4 = arith.constant 0 : index
    %3 = vector.load %arg3[%c0_3, %c0_4] : memref<1x128xf32, #tpu.memory_space<vmem>>, vector<1x128xf32>
    %4 = vector.broadcast %3 : vector<1x128xf32> to vector<8x128xf32>
    %5 = arith.addf %2, %4 : vector<8x128xf32>
    %cst_5 = arith.constant 0.000000e+00 : f32
    %6 = vector.broadcast %cst_5 : f32 to vector<8x128xf32>
    %7 = arith.maximumf %5, %6 : vector<8x128xf32>
    %c0_6 = arith.constant 0 : index
    %c0_7 = arith.constant 0 : index
    %8 = vector.load %arg4[%c0_6, %c0_7] : memref<1x128xf32, #tpu.memory_space<vmem>>, vector<1x128xf32>
    %9 = vector.broadcast %8 : vector<1x128xf32> to vector<8x128xf32>
    %10 = arith.mulf %7, %9 : vector<8x128xf32>
    %cst_8 = arith.constant dense<0.000000e+00> : vector<8xf32>
    %11 = vector.multi_reduction <add>, %10, %cst_8 [1] : vector<8x128xf32> to vector<8xf32>
    %12 = vector.shape_cast %11 : vector<8xf32> to vector<8x1xf32>
    %c0_9 = arith.constant 0 : index
    %c0_10 = arith.constant 0 : index
    %13 = memref.load %arg5[%c0_9, %c0_10] : memref<1x1xf32, #tpu.memory_space<smem>>
    %14 = vector.broadcast %13 : f32 to vector<8x1xf32>
    %15 = arith.addf %12, %14 : vector<8x1xf32>
    %16 = arith.negf %15 : vector<8x1xf32>
    %17 = math.exp %16 : vector<8x1xf32>
    %cst_11 = arith.constant 1.000000e+00 : f32
    %18 = vector.broadcast %cst_11 : f32 to vector<8x1xf32>
    %19 = arith.addf %18, %17 : vector<8x1xf32>
    %20 = arith.divf %18, %19 : vector<8x1xf32>
    %c0_12 = arith.constant 0 : index
    %c0_13 = arith.constant 0 : index
    %21 = vector.load %arg6[%c0_12, %c0_13] : memref<8x1xf32, #tpu.memory_space<vmem>>, vector<8x1xf32>
    tpu.vector_store %arg6[%c0_12, %c0_13], %20 {strides = array<i32>} : memref<8x1xf32, #tpu.memory_space<vmem>>, vector<8x1xf32>,
    return
  }
  func.func @transform_0(%arg0: i32) -> (i32, i32) {
    %c0_i32 = arith.constant 0 : i32
    %c0_i32_0 = arith.constant 0 : i32
    return %arg0, %c0_i32 : i32, i32
  }
  func.func @transform_1(%arg0: i32) -> (i32, i32) {
    %c0_i32 = arith.constant 0 : i32
    %c0_i32_0 = arith.constant 0 : i32
    %c0_i32_1 = arith.constant 0 : i32
    return %c0_i32, %c0_i32_0 : i32, i32
  }
  func.func @transform_2(%arg0: i32) -> (i32, i32) {
    %c0_i32 = arith.constant 0 : i32
    %c0_i32_0 = arith.constant 0 : i32
    %c0_i32_1 = arith.constant 0 : i32
    return %c0_i32, %c0_i32_0 : i32, i32
  }
  func.func @transform_3(%arg0: i32) -> (i32, i32) {
    %c0_i32 = arith.constant 0 : i32
    %c0_i32_0 = arith.constant 0 : i32
    %c0_i32_1 = arith.constant 0 : i32
    return %c0_i32, %c0_i32_0 : i32, i32
  }
  func.func @transform_4(%arg0: i32) -> (i32, i32) {
    %c0_i32 = arith.constant 0 : i32
    %c0_i32_0 = arith.constant 0 : i32
    %c0_i32_1 = arith.constant 0 : i32
    return %c0_i32, %c0_i32_0 : i32, i32
  }
  func.func @transform_5(%arg0: i32) -> (i32, i32) {
    %c0_i32 = arith.constant 0 : i32
    %c0_i32_0 = arith.constant 0 : i32
    return %arg0, %c0_i32 : i32, i32
  }
}

</mosaic_0001>

<bundles_post_ra>
// kernel: tpu_custom_call.1
= control target key start
LH: loop header
LB: loop body
LE: loop exit
PB: predicated region body
PF: predicated region fallthrough
CT: control target
= control target key end

     0   :  { %11 = vsyncpa [#allocation4], 0  ;;  %s745_s0 = inlined_call_operand.hbm [shape: f32[8,1024], index: 0, kind: input, shape index: {}]   ;;  %s746_s1 = inlined_call_operand.hbm [shape: f32[1024,128], index: 1, kind: input, shape index: {}]   ;;  %s747_s2 = inlined_call_operand.vmem [shape: f32[1,128], index: 2, kind: input, shape index: {}]   ;;  %s748_s3 = inlined_call_operand.vmem [shape: f32[1,128], index: 3, kind: input, shape index: {}]   ;;  %s749_s4 = inlined_call_operand.<no memory space> [shape: f32[1,1], index: 4, kind: input, shape index: {}]   ;;  %s750_s5 = inlined_call_operand.vmem [shape: f32[8,1], index: 5, kind: output, shape index: {}]  }
   0x1   :  { %12 = vsyncpa [#allocation6], 0  ;;  %s693_s18 = smov [#allocation3]   ;;  %s694_s20 = smov [#allocation5]  }
   0x2   :  { %s19_s19 = sshll.u32 %s693_s18, 4  ;;  %s28_s21 = sshll.u32 %s694_s20, 4  ;;  %s20_s19 = int_to_ptr.vmem [resolvable:$true] %s19_s19  ;;  %s29_s21 = int_to_ptr.vmem [resolvable:$true] %s28_s21 }
   0x3   :  { %s657_s22 = scalar_lea.vmem %s20_s19, 1024  ;;  %p662_p1 = scmp.lt.s32.totalorder %s20_s19, %s20_s19 }
   0x4   :  { %p658_p0 = scmp.ne.s32.totalorder %s20_s19, %s657_s22  ;;  %p663_p2 = scmp.lt.s32.totalorder %s657_s22, %s657_s22 }
   0x6   :  { %p664_p3 = por %p663_p2, %p662_p1 }
   0x8   :  { %p665_p4 = pnand %p664_p3, %p658_p0 }
   0xa   :  { %668 = shalt.err (!%p665_p4)
}
   0xb   :  { %22 = dma.hbm_to_vmem [thread:$0]  %s745_s0, 1024, %s20_s19, [#allocation4]  }
   0xc   :  { %s677_s25 = scalar_lea.vmem %s29_s21, 16384  ;;  %p682_p6 = scmp.lt.s32.totalorder %s29_s21, %s29_s21 }
   0xd   :  { %p678_p5 = scmp.ne.s32.totalorder %s29_s21, %s677_s25  ;;  %p683_p7 = scmp.lt.s32.totalorder %s677_s25, %s677_s25 }
   0xf   :  { %p684_p8 = por %p683_p7, %p682_p6 }
  0x11   :  { %p685_p9 = pnand %p684_p8, %p678_p5 }
  0x13   :  { %688 = shalt.err (!%p685_p9)
}
  0x14   :  { %s695_s26 = smov 128   ;;  %s696_s27 = smov 8  }
  0x15   :  { %34 = dma.hbm_to_vmem [thread:$0]  %s746_s1, 16384, %s29_s21, [#allocation6], %s695_s26, %s695_s26, %s696_s27  }
  0x16   :  { %689 = dma.done.wait [#allocation4], 1024  }
  0x17   :  { %690 = vsyncadd [#allocation4], 4294966272 }
  0x18   :  { %691 = dma.done.wait [#allocation6], 16384  }
  0x19   :  { %692 = vsyncadd [#allocation6], 4294950912  ;;  %v86_v0 = vld [vmem:[#allocation5 + $0xf8] sm:$0xff]  ;;  %v85_v4 = vld [vmem:[#allocation5 + $0xf0] sm:$0xff]  ;;  %vm490_vm0 = vcmask 7168  }
  0x1a   :  { %v118_v1 = vld [vmem:[#allocation5 + $0x1f8] sm:$0xff]  ;;  %501 = vmatprep.subr.mxu0 %v86_v0  ;;  %v117_v5 = vld [vmem:[#allocation5 + $0x1f0] sm:$0xff]  ;;  %v84_v8 = vld [vmem:[#allocation5 + $0xe8] sm:$0xff] }
  0x1b   :  { %v70_v2 = vld [vmem:[#allocation5 + $0x78] sm:$0xff]  ;;  %536 = vmatprep.subr.mxu1 %v118_v1  ;;  %v69_v6 = vld [vmem:[#allocation5 + $0x70] sm:$0xff]  ;;  %v116_v9 = vld [vmem:[#allocation5 + $0x1e8] sm:$0xff] }
  0x1c   :  { %v102_v3 = vld [vmem:[#allocation5 + $0x178] sm:$0xff]  ;;  %502 = vmatpush3.msra.mxu0 %v70_v2  ;;  %v101_v7 = vld [vmem:[#allocation5 + $0x170] sm:$0xff]  ;;  %v68_v10 = vld [vmem:[#allocation5 + $0x68] sm:$0xff] }
  0x1d   :  { %537 = vmatpush3.msra.mxu1 %v102_v3  ;;  %503 = vmatprep.subr.mxu0 %v85_v4  ;;  %v100_v11 = vld [vmem:[#allocation5 + $0x168] sm:$0xff]  ;;  %v83_v12 = vld [vmem:[#allocation5 + $0xe0] sm:$0xff]  ;;  %v82_v16 = vld [vmem:[#allocation5 + $0xd8] sm:$0xff] }
  0x1e   :  { %538 = vmatprep.subr.mxu1 %v117_v5  ;;  %504 = vmatpush3.msra.mxu0 %v69_v6  ;;  %v115_v13 = vld [vmem:[#allocation5 + $0x1e0] sm:$0xff]  ;;  %v114_v17 = vld [vmem:[#allocation5 + $0x1d8] sm:$0xff]  ;;  %v81_v20 = vld [vmem:[#allocation5 + $0xd0] sm:$0xff] }
  0x1f   :  { %539 = vmatpush3.msra.mxu1 %v101_v7  ;;  %505 = vmatprep.subr.mxu0 %v84_v8  ;;  %v67_v14 = vld [vmem:[#allocation5 + $0x60] sm:$0xff]  ;;  %v66_v18 = vld [vmem:[#allocation5 + $0x58] sm:$0xff]  ;;  %v113_v21 = vld [vmem:[#allocation5 + $0x1d0] sm:$0xff] }
  0x20   :  { %540 = vmatprep.subr.mxu1 %v116_v9  ;;  %v99_v15 = vld [vmem:[#allocation5 + $0x160] sm:$0xff]  ;;  %506 = vmatpush3.msra.mxu0 %v68_v10  ;;  %v98_v19 = vld [vmem:[#allocation5 + $0x158] sm:$0xff]  ;;  %v65_v22 = vld [vmem:[#allocation5 + $0x50] sm:$0xff] }
  0x21   :  { %541 = vmatpush3.msra.mxu1 %v100_v11  ;;  %507 = vmatprep.subr.mxu0 %v83_v12  ;;  %v97_v23 = vld [vmem:[#allocation5 + $0x150] sm:$0xff]  ;;  %v80_v24 = vld [vmem:[#allocation5 + $0xc8] sm:$0xff]  ;;  %v79_v28 = vld [vmem:[#allocation5 + $0xc0] sm:$0xff] }
  0x22   :  { %542 = vmatprep.subr.mxu1 %v115_v13  ;;  %508 = vmatpush3.msra.mxu0 %v67_v14  ;;  %v112_v25 = vld [vmem:[#allocation5 + $0x1c8] sm:$0xff]  ;;  %v111_v29 = vld [vmem:[#allocation5 + $0x1c0] sm:$0xff]  ;;  %v78_v32 = vld [vmem:[#allocation5 + $0xb8] sm:$0xff] }
  0x23   :  { %543 = vmatpush3.msra.mxu1 %v99_v15  ;;  %509 = vmatprep.subr.mxu0 %v82_v16  ;;  %v64_v26 = vld [vmem:[#allocation5 + $0x48] sm:$0xff]  ;;  %v63_v30 = vld [vmem:[#allocation5 + $0x40] sm:$0xff]  ;;  %v110_v33 = vld [vmem:[#allocation5 + $0x1b8] sm:$0xff] }
  0x24   :  { %544 = vmatprep.subr.mxu1 %v114_v17  ;;  %510 = vmatpush3.msra.mxu0 %v66_v18  ;;  %v96_v27 = vld [vmem:[#allocation5 + $0x148] sm:$0xff]  ;;  %v95_v31 = vld [vmem:[#allocation5 + $0x140] sm:$0xff]  ;;  %v62_v34 = vld [vmem:[#allocation5 + $0x38] sm:$0xff] }
  0x25   :  { %545 = vmatpush3.msra.mxu1 %v98_v19  ;;  %511 = vmatprep.subr.mxu0 %v81_v20  ;;  %v94_v35 = vld [vmem:[#allocation5 + $0x138] sm:$0xff]  ;;  %v77_v36 = vld [vmem:[#allocation5 + $0xb0] sm:$0xff]  ;;  %v76_v40 = vld [vmem:[#allocation5 + $0xa8] sm:$0xff] }
  0x26   :  { %546 = vmatprep.subr.mxu1 %v113_v21  ;;  %512 = vmatpush3.msra.mxu0 %v65_v22  ;;  %v109_v37 = vld [vmem:[#allocation5 + $0x1b0] sm:$0xff]  ;;  %v108_v41 = vld [vmem:[#allocation5 + $0x1a8] sm:$0xff]  ;;  %v75_v44 = vld [vmem:[#allocation5 + $0xa0] sm:$0xff] }
  0x27   :  { %547 = vmatpush3.msra.mxu1 %v97_v23  ;;  %513 = vmatprep.subr.mxu0 %v80_v24  ;;  %v61_v38 = vld [vmem:[#allocation5 + $0x30] sm:$0xff]  ;;  %v60_v42 = vld [vmem:[#allocation5 + $0x28] sm:$0xff]  ;;  %v107_v45 = vld [vmem:[#allocation5 + $0x1a0] sm:$0xff] }
  0x28   :  { %548 = vmatprep.subr.mxu1 %v112_v25  ;;  %514 = vmatpush3.msra.mxu0 %v64_v26  ;;  %v93_v39 = vld [vmem:[#allocation5 + $0x130] sm:$0xff]  ;;  %v92_v43 = vld [vmem:[#allocation5 + $0x128] sm:$0xff]  ;;  %v59_v46 = vld [vmem:[#allocation5 + $0x20] sm:$0xff] }
  0x29   :  { %549 = vmatpush3.msra.mxu1 %v96_v27  ;;  %515 = vmatprep.subr.mxu0 %v79_v28  ;;  %v91_v47 = vld [vmem:[#allocation5 + $0x120] sm:$0xff]  ;;  %v74_v48 = vld [vmem:[#allocation5 + $0x98] sm:$0xff]  ;;  %v73_v52 = vld [vmem:[#allocation5 + $0x90] sm:$0xff] }
  0x2a   :  { %550 = vmatprep.subr.mxu1 %v111_v29  ;;  %516 = vmatpush3.msra.mxu0 %v63_v30  ;;  %v106_v49 = vld [vmem:[#allocation5 + $0x198] sm:$0xff]  ;;  %v105_v53 = vld [vmem:[#allocation5 + $0x190] sm:$0xff]  ;;  %v72_v56 = vld [vmem:[#allocation5 + $0x88] sm:$0xff] }
  0x2b   :  { %551 = vmatpush3.msra.mxu1 %v95_v31  ;;  %517 = vmatprep.subr.mxu0 %v78_v32  ;;  %v58_v50 = vld [vmem:[#allocation5 + $0x18] sm:$0xff]  ;;  %v57_v54 = vld [vmem:[#allocation5 + $0x10] sm:$0xff]  ;;  %v104_v57 = vld [vmem:[#allocation5 + $0x188] sm:$0xff] }
  0x2c   :  { %552 = vmatprep.subr.mxu1 %v110_v33  ;;  %518 = vmatpush3.msra.mxu0 %v62_v34  ;;  %v90_v51 = vld [vmem:[#allocation5 + $0x118] sm:$0xff]  ;;  %v89_v55 = vld [vmem:[#allocation5 + $0x110] sm:$0xff]  ;;  %v56_v58 = vld [vmem:[#allocation5 + $0x8] sm:$0xff] }
  0x2d   :  { %553 = vmatpush3.msra.mxu1 %v94_v35  ;;  %519 = vmatprep.subr.mxu0 %v77_v36  ;;  %v88_v59 = vld [vmem:[#allocation5 + $0x108] sm:$0xff]  ;;  %v71_v60 = vld [vmem:[#allocation5 + $0x80] sm:$0xff]  ;;  %v50_v2 = vld [vmem:[#allocation3 + $0x18] sm:$0xff] }
  0x2e   :  { %554 = vmatprep.subr.mxu1 %v109_v37  ;;  %520 = vmatpush3.msra.mxu0 %v61_v38  ;;  %v103_v61 = vld [vmem:[#allocation5 + $0x180] sm:$0xff]  ;;  %v48_v63 = vld [vmem:[#allocation3 + $0x8] sm:$0xff]  ;;  %v150_v3 = vld [vmem:[#allocation5 + $0x2f8] sm:$0xff] }
  0x2f   :  { %555 = vmatpush3.msra.mxu1 %v93_v39  ;;  %521 = vmatprep.subr.mxu0 %v76_v40  ;;  %v55_v62 = vld [vmem:[#allocation5] sm:$0xff]  ;;  %v182_v4 = vld [vmem:[#allocation5 + $0x3f8] sm:$0xff]  ;;  %v49_v5 = vld [vmem:[#allocation3 + $0x10] sm:$0xff] }
  0x30   :  { %556 = vmatprep.subr.mxu1 %v108_v41  ;;  %522 = vmatpush3.msra.mxu0 %v60_v42  ;;  %v87_v0 = vld [vmem:[#allocation5 + $0x100] sm:$0xff]  ;;  %v134_v6 = vld [vmem:[#allocation5 + $0x278] sm:$0xff]  ;;  %v149_v8 = vld [vmem:[#allocation5 + $0x2f0] sm:$0xff] }
  0x31   :  { %557 = vmatpush3.msra.mxu1 %v92_v43  ;;  %523 = vmatprep.subr.mxu0 %v75_v44  ;;  %v47_v1 = vld [vmem:[#allocation3] sm:$0xff]  ;;  %v166_v7 = vld [vmem:[#allocation5 + $0x378] sm:$0xff]  ;;  %v181_v9 = vld [vmem:[#allocation5 + $0x3f0] sm:$0xff] }
  0x32   :  { %558 = vmatprep.subr.mxu1 %v107_v45  ;;  %524 = vmatpush3.msra.mxu0 %v59_v46  ;;  %v133_v10 = vld [vmem:[#allocation5 + $0x270] sm:$0xff]  ;;  %v148_v12 = vld [vmem:[#allocation5 + $0x2e8] sm:$0xff]  ;;  %v147_v16 = vld [vmem:[#allocation5 + $0x2e0] sm:$0xff] }
  0x33   :  { %559 = vmatpush3.msra.mxu1 %v91_v47  ;;  %525 = vmatprep.subr.mxu0 %v74_v48  ;;  %v165_v11 = vld [vmem:[#allocation5 + $0x370] sm:$0xff]  ;;  %v180_v13 = vld [vmem:[#allocation5 + $0x3e8] sm:$0xff]  ;;  %v179_v17 = vld [vmem:[#allocation5 + $0x3e0] sm:$0xff] }
  0x34   :  { %560 = vmatprep.subr.mxu1 %v106_v49  ;;  %526 = vmatpush3.msra.mxu0 %v58_v50  ;;  %v132_v14 = vld [vmem:[#allocation5 + $0x268] sm:$0xff]  ;;  %v131_v18 = vld [vmem:[#allocation5 + $0x260] sm:$0xff]  ;;  %v146_v20 = vld [vmem:[#allocation5 + $0x2d8] sm:$0xff] }
  0x35   :  { %561 = vmatpush3.msra.mxu1 %v90_v51  ;;  %527 = vmatprep.subr.mxu0 %v73_v52  ;;  %v164_v15 = vld [vmem:[#allocation5 + $0x368] sm:$0xff]  ;;  %v163_v19 = vld [vmem:[#allocation5 + $0x360] sm:$0xff]  ;;  %v178_v21 = vld [vmem:[#allocation5 + $0x3d8] sm:$0xff] }
  0x36   :  { %562 = vmatprep.subr.mxu1 %v105_v53  ;;  %528 = vmatpush3.msra.mxu0 %v57_v54  ;;  %v130_v22 = vld [vmem:[#allocation5 + $0x258] sm:$0xff]  ;;  %v145_v24 = vld [vmem:[#allocation5 + $0x2d0] sm:$0xff]  ;;  %v144_v28 = vld [vmem:[#allocation5 + $0x2c8] sm:$0xff] }
  0x37   :  { %563 = vmatpush3.msra.mxu1 %v89_v55  ;;  %529 = vmatprep.subr.mxu0 %v72_v56  ;;  %v162_v23 = vld [vmem:[#allocation5 + $0x358] sm:$0xff]  ;;  %v177_v25 = vld [vmem:[#allocation5 + $0x3d0] sm:$0xff]  ;;  %v176_v29 = vld [vmem:[#allocation5 + $0x3c8] sm:$0xff] }
  0x38   :  { %564 = vmatprep.subr.mxu1 %v104_v57  ;;  %530 = vmatpush3.msra.mxu0 %v56_v58  ;;  %v129_v26 = vld [vmem:[#allocation5 + $0x250] sm:$0xff]  ;;  %v128_v30 = vld [vmem:[#allocation5 + $0x248] sm:$0xff]  ;;  %v143_v32 = vld [vmem:[#allocation5 + $0x2c0] sm:$0xff] }
  0x39   :  { %565 = vmatpush3.msra.mxu1 %v88_v59  ;;  %531 = vmatprep.subr.mxu0 %v71_v60  ;;  %v161_v27 = vld [vmem:[#allocation5 + $0x350] sm:$0xff]  ;;  %v160_v31 = vld [vmem:[#allocation5 + $0x348] sm:$0xff]  ;;  %v175_v33 = vld [vmem:[#allocation5 + $0x3c0] sm:$0xff] }
  0x3a   :  { %566 = vmatprep.subr.mxu1 %v103_v61  ;;  %532 = vmatpush3.msra.mxu0 %v55_v62  ;;  %v127_v34 = vld [vmem:[#allocation5 + $0x240] sm:$0xff]  ;;  %v142_v36 = vld [vmem:[#allocation5 + $0x2b8] sm:$0xff]  ;;  %v141_v40 = vld [vmem:[#allocation5 + $0x2b0] sm:$0xff] }
  0x3b   :  { %254 = vmatprep.mubr.f32.mxu0 %v48_v63  ;;  %567 = vmatpush3.msra.mxu1 %v87_v0  ;;  %v159_v35 = vld [vmem:[#allocation5 + $0x340] sm:$0xff]  ;;  %v174_v37 = vld [vmem:[#allocation5 + $0x3b8] sm:$0xff]  ;;  %v173_v41 = vld [vmem:[#allocation5 + $0x3b0] sm:$0xff] }
  0x3c   :  { %255 = vmatmul.mubr.f32.vlgmr.msra.gmra.mxu0 %v47_v1  ;;  %324 = vmatprep.mubr.f32.mxu1 %v50_v2  ;;  %v126_v38 = vld [vmem:[#allocation5 + $0x238] sm:$0xff]  ;;  %v125_v42 = vld [vmem:[#allocation5 + $0x230] sm:$0xff]  ;;  %v140_v44 = vld [vmem:[#allocation5 + $0x2a8] sm:$0xff] }
  0x3d   :  { %571 = vmatprep.subr.mxu0 %v150_v3  ;;  %606 = vmatprep.subr.mxu1 %v182_v4  ;;  %v158_v39 = vld [vmem:[#allocation5 + $0x338] sm:$0xff]  ;;  %v157_v43 = vld [vmem:[#allocation5 + $0x330] sm:$0xff]  ;;  %v172_v45 = vld [vmem:[#allocation5 + $0x3a8] sm:$0xff] }
  0x3e   :  { %325 = vmatmul.mubr.f32.vlgmr.msra.gmra.mxu1 %v49_v5  ;;  %572 = vmatpush3.msra.mxu0 %v134_v6  ;;  %v124_v46 = vld [vmem:[#allocation5 + $0x228] sm:$0xff]  ;;  %v139_v48 = vld [vmem:[#allocation5 + $0x2a0] sm:$0xff]  ;;  %v138_v52 = vld [vmem:[#allocation5 + $0x298] sm:$0xff] }
  0x3f   :  { %607 = vmatpush3.msra.mxu1 %v166_v7  ;;  %573 = vmatprep.subr.mxu0 %v149_v8  ;;  %v156_v47 = vld [vmem:[#allocation5 + $0x328] sm:$0xff]  ;;  %v171_v49 = vld [vmem:[#allocation5 + $0x3a0] sm:$0xff]  ;;  %v170_v53 = vld [vmem:[#allocation5 + $0x398] sm:$0xff] }
  0x40   :  { %608 = vmatprep.subr.mxu1 %v181_v9  ;;  %574 = vmatpush3.msra.mxu0 %v133_v10  ;;  %v123_v50 = vld [vmem:[#allocation5 + $0x220] sm:$0xff]  ;;  %v122_v54 = vld [vmem:[#allocation5 + $0x218] sm:$0xff]  ;;  %v137_v56 = vld [vmem:[#allocation5 + $0x290] sm:$0xff] }
  0x41   :  { %609 = vmatpush3.msra.mxu1 %v165_v11  ;;  %575 = vmatprep.subr.mxu0 %v148_v12  ;;  %v155_v51 = vld [vmem:[#allocation5 + $0x320] sm:$0xff]  ;;  %v154_v55 = vld [vmem:[#allocation5 + $0x318] sm:$0xff]  ;;  %v169_v57 = vld [vmem:[#allocation5 + $0x390] sm:$0xff] }
  0x42   :  { %610 = vmatprep.subr.mxu1 %v180_v13  ;;  %576 = vmatpush3.msra.mxu0 %v132_v14  ;;  %v121_v58 = vld [vmem:[#allocation5 + $0x210] sm:$0xff]  ;;  %v136_v60 = vld [vmem:[#allocation5 + $0x288] sm:$0xff]  ;;  %v135_v0 = vld [vmem:[#allocation5 + $0x280] sm:$0xff] }
  0x43   :  { %611 = vmatpush3.msra.mxu1 %v164_v15  ;;  %577 = vmatprep.subr.mxu0 %v147_v16  ;;  %v153_v59 = vld [vmem:[#allocation5 + $0x310] sm:$0xff]  ;;  %v168_v61 = vld [vmem:[#allocation5 + $0x388] sm:$0xff]  ;;  %v167_v1 = vld [vmem:[#allocation5 + $0x380] sm:$0xff] }
  0x44   :  { %612 = vmatprep.subr.mxu1 %v179_v17  ;;  %578 = vmatpush3.msra.mxu0 %v131_v18  ;;  %v120_v62 = vld [vmem:[#allocation5 + $0x208] sm:$0xff]  ;;  %v119_v2 = vld [vmem:[#allocation5 + $0x200] sm:$0xff]  ;;  %v54_v5 = vld [vmem:[#allocation3 + $0x38] sm:$0xff] }
  0x45   :  { %613 = vmatpush3.msra.mxu1 %v163_v19  ;;  %579 = vmatprep.subr.mxu0 %v146_v20  ;;  %v152_v63 = vld [vmem:[#allocation5 + $0x308] sm:$0xff]  ;;  %v151_v4 = vld [vmem:[#allocation5 + $0x300] sm:$0xff]  ;;  %v53_v7 = vld [vmem:[#allocation3 + $0x30] sm:$0xff] }
  0x46   :  { %614 = vmatprep.subr.mxu1 %v178_v21  ;;  %580 = vmatpush3.msra.mxu0 %v130_v22  ;;  %v52_v3 = vld [vmem:[#allocation3 + $0x28] sm:$0xff]  ;;  %v51_v6 = vld [vmem:[#allocation3 + $0x20] sm:$0xff] }
  0x47   :  { %615 = vmatpush3.msra.mxu1 %v162_v23  ;;  %581 = vmatprep.subr.mxu0 %v145_v24  ;;  %v498_v12 = vld [vmem:[%s747_s2] ss:$0 sm:$0xff] }
  0x48   :  { %616 = vmatprep.subr.mxu1 %v177_v25  ;;  %582 = vmatpush3.msra.mxu0 %v129_v26  ;;  %v499_v25 = vld [vmem:[%s748_s3] ss:$0 sm:$0xff] }
  0x49   :  { %617 = vmatpush3.msra.mxu1 %v161_v27  ;;  %583 = vmatprep.subr.mxu0 %v144_v28  ;;  %v482_v28 = vstv %s749_s4 }
  0x4a   :  { %618 = vmatprep.subr.mxu1 %v176_v29  ;;  %584 = vmatpush3.msra.mxu0 %v128_v30 }
  0x4b   :  { %619 = vmatpush3.msra.mxu1 %v160_v31  ;;  %585 = vmatprep.subr.mxu0 %v143_v32 }
  0x4c   :  { %620 = vmatprep.subr.mxu1 %v175_v33  ;;  %586 = vmatpush3.msra.mxu0 %v127_v34 }
  0x4d   :  { %621 = vmatpush3.msra.mxu1 %v159_v35  ;;  %587 = vmatprep.subr.mxu0 %v142_v36 }
  0x4e   :  { %622 = vmatprep.subr.mxu1 %v174_v37  ;;  %588 = vmatpush3.msra.mxu0 %v126_v38 }
  0x4f   :  { %623 = vmatpush3.msra.mxu1 %v158_v39  ;;  %589 = vmatprep.subr.mxu0 %v141_v40 }
  0x50   :  { %624 = vmatprep.subr.mxu1 %v173_v41  ;;  %590 = vmatpush3.msra.mxu0 %v125_v42 }
  0x51   :  { %625 = vmatpush3.msra.mxu1 %v157_v43  ;;  %591 = vmatprep.subr.mxu0 %v140_v44 }
  0x52   :  { %626 = vmatprep.subr.mxu1 %v172_v45  ;;  %592 = vmatpush3.msra.mxu0 %v124_v46 }
  0x53   :  { %627 = vmatpush3.msra.mxu1 %v156_v47  ;;  %593 = vmatprep.subr.mxu0 %v139_v48 }
  0x54   :  { %628 = vmatprep.subr.mxu1 %v171_v49  ;;  %594 = vmatpush3.msra.mxu0 %v123_v50 }
  0x55   :  { %629 = vmatpush3.msra.mxu1 %v155_v51  ;;  %595 = vmatprep.subr.mxu0 %v138_v52 }
  0x56   :  { %630 = vmatprep.subr.mxu1 %v170_v53  ;;  %596 = vmatpush3.msra.mxu0 %v122_v54 }
  0x57   :  { %631 = vmatpush3.msra.mxu1 %v154_v55  ;;  %597 = vmatprep.subr.mxu0 %v137_v56 }
  0x58   :  { %632 = vmatprep.subr.mxu1 %v169_v57  ;;  %598 = vmatpush3.msra.mxu0 %v121_v58 }
  0x59   :  { %633 = vmatpush3.msra.mxu1 %v153_v59  ;;  %599 = vmatprep.subr.mxu0 %v136_v60 }
  0x5a   :  { %634 = vmatprep.subr.mxu1 %v168_v61  ;;  %600 = vmatpush3.msra.mxu0 %v120_v62 }
  0x5b   :  { %635 = vmatpush3.msra.mxu1 %v152_v63  ;;  %601 = vmatprep.subr.mxu0 %v135_v0 }
  0x5c   :  { %636 = vmatprep.subr.mxu1 %v167_v1  ;;  %602 = vmatpush3.msra.mxu0 %v119_v2 }
  0x5d   :  { %394 = vmatprep.mubr.f32.mxu0 %v52_v3  ;;  %637 = vmatpush3.msra.mxu1 %v151_v4 }
  0x5e   :  { %464 = vmatprep.mubr.f32.mxu1 %v54_v5  ;;  %395 = vmatmul.mubr.f32.vlgmr.msra.gmra.mxu0 %v51_v6 }
  0x5f   :  { %465 = vmatmul.mubr.f32.vlgmr.msra.gmra.mxu1 %v53_v7 }
  0xfc   :  { %v533_v8 = vpop.f32.mrf.mxu0 }
  0xfe   :  { %v568_v9 = vpop.f32.mrf.mxu1  ;;  %v534_v10 = vpop.f32.mrf.mxu0 }
  0xff   :  { %v535_v11 = vadd.f32 %v534_v10, %v533_v8 }
 0x100   :  { %v569_v13 = vpop.f32.mrf.mxu1 }
 0x101   :  { %v257_v14 = vadd.f32 %v535_v11, %v498_v12  ;;  %v570_v15 = vadd.f32 %v569_v13, %v568_v9 }
 0x103   :  { %v327_v20 = vadd.f32 %v570_v15, %v257_v14 }
 0x11e   :  { %v603_v16 = vpop.f32.mrf.mxu0 }
 0x11f   :  { %v638_v17 = vpop.f32.mrf.mxu1 }
 0x120   :  { %v604_v18 = vpop.f32.mrf.mxu0 }
 0x121   :  { %v639_v19 = vpop.f32.mrf.mxu1  ;;  %v605_v21 = vadd.f32 %v604_v18, %v603_v16 }
 0x122   :  { %v640_v23 = vadd.f32 %v639_v19, %v638_v17 }
 0x123   :  { %v397_v22 = vadd.f32 %v605_v21, %v327_v20 }
 0x125   :  { %v467_v24 = vadd.f32 %v640_v23, %v397_v22 }
 0x127   :  { %v470_v26 = vmax.f32 %v467_v24, 0.0 }
 0x129   :  { %v478_v27 = vmul.f32 %v499_v25, %v470_v26 }
 0x12b   :  { %479 = vadd.xlane.f32.xlu0 %v478_v27 }
 0x1b4   :  { %v480_v29 = vpop.xlane.xlu0 %479 }
 0x1b5   :  { %v483_v30 = vadd.f32 %v482_v28, %v480_v29 }
 0x1b7   :  { %v500_v31 = vmul.f32 -1.442695, %v483_v30 }
 0x1b9   :  { %645 = vpow2.f32 %v500_v31 }
 0x1c6   :  { %v646_v32 = vpop.eup %645 }
 0x1c7   :  { %v487_v33 = vadd.f32 1.0, %v646_v32 }
 0x1c9   :  { %647 = vrcp.f32 %v487_v33 }
 0x1d6   :  { %v648_v34 = vpop.eup %647 }
 0x1d7   :  { %491 = vst.msk [vmem:[%s750_s5] sm:$0xff] %vm490_vm0, %v648_v34 }
 0x1d8   :  { %496 = vsyncpa [#allocation4], 1 }
 0x1d9   :  { %497 = vsyncpa [#allocation6], 1 }

</bundles_post_ra>
